<compile_context>
chip_gen: v5e
topology: v5e:2x2
jax: 0.10.0
libtpu: 0.0.40
codegen_flags: <defaults>
</compile_context>

<pallas_src>
import functools

import jax
import jax.numpy as jnp
from jax.experimental import pallas as pl
from jax.experimental.pallas import tpu as pltpu


def _gpt_embed_kernel(ids_ref, tok_emb_hbm, pos_ref, out_ref, gather_buf, sems,
                      *, tile_t, vocab_size):
    # ids_ref:      (B*T,) int32, SMEM (scalar prefetch) — flattened token ids
    # tok_emb_hbm:  (V, D)  float32, HBM-resident token embedding table
    # pos_ref:      (tile_t, D) float32, VMEM — contiguous positional slice
    # out_ref:      (1, tile_t, D) float32, VMEM output block
    # gather_buf:   (tile_t, D) float32, VMEM scratch for gathered token rows
    # sems:         (tile_t,) DMA semaphores (one per gathered row)
    b = pl.program_id(0)
    tj = pl.program_id(1)
    seq_len = tile_t * pl.num_programs(1)
    base = b * seq_len + tj * tile_t

    # Issue all row-gather DMAs for this tile first (they run concurrently),
    # then wait for them. Token ids are read from SMEM on the scalar path.
    copies = []
    for i in range(tile_t):
        tok = ids_ref[base + i]
        tok = jnp.minimum(jnp.maximum(tok, 0), vocab_size - 1)  # clamp OOB ids
        cp = pltpu.make_async_copy(tok_emb_hbm.at[pl.ds(tok, 1), :],
                                   gather_buf.at[pl.ds(i, 1), :],
                                   sems.at[i])
        cp.start()
        copies.append(cp)
    for cp in copies:
        cp.wait()

    # Positional add: contiguous slice selected by the BlockSpec index_map,
    # so this is just one lane-dense VPU add (no one-hot, no MXU).
    out_ref[0] = (gather_buf[...] + pos_ref[...]).astype(out_ref.dtype)


def gpt_forward(x, tok_emb, pos_emb, *, tile_t=None):
    """x: (B, T) int32 token ids -> (B, T, D): tok_emb[x] + pos_emb[arange(T)]."""
    b, t = x.shape
    v, d = tok_emb.shape
    if tile_t is None:
        tile_t = t
    assert t % tile_t == 0, "tile_t must divide the sequence length"
    assert tile_t % 8 == 0 or tile_t == t, "tile_t should be sublane-aligned"
    assert d % 128 == 0, "d_model must be lane-dense (multiple of 128)"

    ids_flat = x.reshape(b * t).astype(jnp.int32)  # 1-D ids -> SMEM via prefetch

    kernel = functools.partial(_gpt_embed_kernel, tile_t=tile_t, vocab_size=v)
    grid = (b, t // tile_t)

    return pl.pallas_call(
        kernel,
        out_shape=jax.ShapeDtypeStruct((b, t, d), tok_emb.dtype),
        grid_spec=pltpu.PrefetchScalarGridSpec(
            num_scalar_prefetch=1,
            grid=grid,
            in_specs=[
                # Token table stays in HBM; rows are DMA-gathered in the kernel.
                pl.BlockSpec(memory_space=pl.ANY),
                # Positional slice for this sequence tile (contiguous rows).
                pl.BlockSpec((tile_t, d), lambda bi, tj, ids: (tj, 0)),
            ],
            out_specs=pl.BlockSpec((1, tile_t, d),
                                   lambda bi, tj, ids: (bi, tj, 0)),
            scratch_shapes=[
                pltpu.VMEM((tile_t, d), tok_emb.dtype),
                pltpu.SemaphoreType.DMA((tile_t,)),
            ],
        ),
        compiler_params=pltpu.CompilerParams(
            dimension_semantics=("parallel", "parallel")),
    )(ids_flat, tok_emb, pos_emb)


if __name__ == "__main__":
    # Small, deterministic configuration consistent with the module.
    vocab_size = 64
    d_model = 128
    max_seq_len = 16
    batch = 2
    seq = 8

    key = jax.random.PRNGKey(0)
    k_tok, k_pos, k_ids = jax.random.split(key, 3)

    # nn.Embedding default init ~ N(0, 1).
    tok_emb = jax.random.normal(k_tok, (vocab_size, d_model), dtype=jnp.float32)
    pos_emb = jax.random.normal(k_pos, (max_seq_len, d_model), dtype=jnp.float32)
    x = jax.random.randint(k_ids, (batch, seq), 0, vocab_size, dtype=jnp.int32)

    out = gpt_forward(x, tok_emb, pos_emb)
    out = jax.block_until_ready(out)

    # Pure-JAX reference check.
    ref = tok_emb[x] + pos_emb[jnp.arange(seq)][None, :, :]
    assert out.shape == (batch, seq, d_model)
    assert jnp.allclose(out, ref, atol=1e-5, rtol=1e-5)

    print("KERNEL_OK")
</pallas_src>

<mosaic_0001>
module attributes {stable_mosaic.version = 11 : i64} {
  func.func @_gpt_embed_kernel(%arg0: i32, %arg1: i32, %arg2: memref<16xi32, #tpu.memory_space<smem>>, %arg3: memref<64x128xf32, #tpu.memory_space<any>>, %arg4: memref<8x128xf32, #tpu.memory_space<vmem>>, %arg5: memref<1x8x128xf32, #tpu.memory_space<vmem>>, %arg6: memref<8x128xf32, #tpu.memory_space<vmem>>, %arg7: memref<8x!tpu.dma_semaphore, #tpu.memory_space<semaphore_mem>>) attributes {dimension_semantics = [#tpu.dimension_semantics<parallel>, #tpu.dimension_semantics<parallel>], iteration_bounds = array<i64: 2, 1>, scalar_prefetch = 1 : i64, scratch_operands = 2 : i64, tpu.core_type = #tpu.core_type<tc>, window_params = [{}, {transform_indices = @transform_1, window_bounds = array<i64: 8, 128>}, {transform_indices = @transform_2, window_bounds = array<i64: 1, 8, 128>}]} {
    %c8_i32 = arith.constant 8 : i32
    %0 = arith.muli %arg0, %c8_i32 : i32
    %c8_i32_0 = arith.constant 8 : i32
    %1 = arith.muli %arg1, %c8_i32_0 : i32
    %2 = arith.addi %0, %1 : i32
    %c0_i32 = arith.constant 0 : i32
    %3 = arith.addi %2, %c0_i32 : i32
    %4 = arith.index_cast %3 : i32 to index
    %5 = memref.load %arg2[%4] : memref<16xi32, #tpu.memory_space<smem>>
    %c0_i32_1 = arith.constant 0 : i32
    %6 = arith.maxsi %5, %c0_i32_1 : i32
    %c63_i32 = arith.constant 63 : i32
    %7 = arith.minsi %6, %c63_i32 : i32
    %c0_i32_2 = arith.constant 0 : i32
    %c0_i32_3 = arith.constant 0 : i32
    %8 = tpu.memref_slice %arg3[%7, %c0_i32_3] : memref<64x128xf32, #tpu.memory_space<any>> -> memref<1x128xf32, #tpu.memory_space<any>>
    %c0_i32_4 = arith.constant 0 : i32
    %c0_i32_5 = arith.constant 0 : i32
    %9 = tpu.memref_slice %arg6[%c0_i32_4, %c0_i32_5] : memref<8x128xf32, #tpu.memory_space<vmem>> -> memref<1x128xf32, #tpu.memory_space<vmem>>
    %10 = tpu.memref_slice %arg7[%c0_i32_2] : memref<8x!tpu.dma_semaphore, #tpu.memory_space<semaphore_mem>> -> memref<1x!tpu.dma_semaphore, #tpu.memory_space<semaphore_mem>>
    %11 = tpu.memref_squeeze %10 : memref<1x!tpu.dma_semaphore, #tpu.memory_space<semaphore_mem>> -> memref<!tpu.dma_semaphore, #tpu.memory_space<semaphore_mem>>
    tpu.enqueue_dma source(%8 : memref<1x128xf32, #tpu.memory_space<any>>) target(%9 : memref<1x128xf32, #tpu.memory_space<vmem>>) target_semaphore(%11 : memref<!tpu.dma_semaphore, #tpu.memory_space<semaphore_mem>>)
    %c1_i32 = arith.constant 1 : i32
    %12 = arith.addi %2, %c1_i32 : i32
    %13 = arith.index_cast %12 : i32 to index
    %14 = memref.load %arg2[%13] : memref<16xi32, #tpu.memory_space<smem>>
    %c0_i32_6 = arith.constant 0 : i32
    %15 = arith.maxsi %14, %c0_i32_6 : i32
    %c63_i32_7 = arith.constant 63 : i32
    %16 = arith.minsi %15, %c63_i32_7 : i32
    %c1_i32_8 = arith.constant 1 : i32
    %c0_i32_9 = arith.constant 0 : i32
    %17 = tpu.memref_slice %arg3[%16, %c0_i32_9] : memref<64x128xf32, #tpu.memory_space<any>> -> memref<1x128xf32, #tpu.memory_space<any>>
    %c1_i32_10 = arith.constant 1 : i32
    %c0_i32_11 = arith.constant 0 : i32
    %18 = tpu.memref_slice %arg6[%c1_i32_10, %c0_i32_11] : memref<8x128xf32, #tpu.memory_space<vmem>> -> memref<1x128xf32, #tpu.memory_space<vmem>>
    %19 = tpu.memref_slice %arg7[%c1_i32_8] : memref<8x!tpu.dma_semaphore, #tpu.memory_space<semaphore_mem>> -> memref<1x!tpu.dma_semaphore, #tpu.memory_space<semaphore_mem>>
    %20 = tpu.memref_squeeze %19 : memref<1x!tpu.dma_semaphore, #tpu.memory_space<semaphore_mem>> -> memref<!tpu.dma_semaphore, #tpu.memory_space<semaphore_mem>>
    tpu.enqueue_dma source(%17 : memref<1x128xf32, #tpu.memory_space<any>>) target(%18 : memref<1x128xf32, #tpu.memory_space<vmem>>) target_semaphore(%20 : memref<!tpu.dma_semaphore, #tpu.memory_space<semaphore_mem>>)
    %c2_i32 = arith.constant 2 : i32
    %21 = arith.addi %2, %c2_i32 : i32
    %22 = arith.index_cast %21 : i32 to index
    %23 = memref.load %arg2[%22] : memref<16xi32, #tpu.memory_space<smem>>
    %c0_i32_12 = arith.constant 0 : i32
    %24 = arith.maxsi %23, %c0_i32_12 : i32
    %c63_i32_13 = arith.constant 63 : i32
    %25 = arith.minsi %24, %c63_i32_13 : i32
    %c2_i32_14 = arith.constant 2 : i32
    %c0_i32_15 = arith.constant 0 : i32
    %26 = tpu.memref_slice %arg3[%25, %c0_i32_15] : memref<64x128xf32, #tpu.memory_space<any>> -> memref<1x128xf32, #tpu.memory_space<any>>
    %c2_i32_16 = arith.constant 2 : i32
    %c0_i32_17 = arith.constant 0 : i32
    %27 = tpu.memref_slice %arg6[%c2_i32_16, %c0_i32_17] : memref<8x128xf32, #tpu.memory_space<vmem>> -> memref<1x128xf32, #tpu.memory_space<vmem>>
    %28 = tpu.memref_slice %arg7[%c2_i32_14] : memref<8x!tpu.dma_semaphore, #tpu.memory_space<semaphore_mem>> -> memref<1x!tpu.dma_semaphore, #tpu.memory_space<semaphore_mem>>
    %29 = tpu.memref_squeeze %28 : memref<1x!tpu.dma_semaphore, #tpu.memory_space<semaphore_mem>> -> memref<!tpu.dma_semaphore, #tpu.memory_space<semaphore_mem>>
    tpu.enqueue_dma source(%26 : memref<1x128xf32, #tpu.memory_space<any>>) target(%27 : memref<1x128xf32, #tpu.memory_space<vmem>>) target_semaphore(%29 : memref<!tpu.dma_semaphore, #tpu.memory_space<semaphore_mem>>)
    %c3_i32 = arith.constant 3 : i32
    %30 = arith.addi %2, %c3_i32 : i32
    %31 = arith.index_cast %30 : i32 to index
    %32 = memref.load %arg2[%31] : memref<16xi32, #tpu.memory_space<smem>>
    %c0_i32_18 = arith.constant 0 : i32
    %33 = arith.maxsi %32, %c0_i32_18 : i32
    %c63_i32_19 = arith.constant 63 : i32
    %34 = arith.minsi %33, %c63_i32_19 : i32
    %c3_i32_20 = arith.constant 3 : i32
    %c0_i32_21 = arith.constant 0 : i32
    %35 = tpu.memref_slice %arg3[%34, %c0_i32_21] : memref<64x128xf32, #tpu.memory_space<any>> -> memref<1x128xf32, #tpu.memory_space<any>>
    %c3_i32_22 = arith.constant 3 : i32
    %c0_i32_23 = arith.constant 0 : i32
    %36 = tpu.memref_slice %arg6[%c3_i32_22, %c0_i32_23] : memref<8x128xf32, #tpu.memory_space<vmem>> -> memref<1x128xf32, #tpu.memory_space<vmem>>
    %37 = tpu.memref_slice %arg7[%c3_i32_20] : memref<8x!tpu.dma_semaphore, #tpu.memory_space<semaphore_mem>> -> memref<1x!tpu.dma_semaphore, #tpu.memory_space<semaphore_mem>>
    %38 = tpu.memref_squeeze %37 : memref<1x!tpu.dma_semaphore, #tpu.memory_space<semaphore_mem>> -> memref<!tpu.dma_semaphore, #tpu.memory_space<semaphore_mem>>
    tpu.enqueue_dma source(%35 : memref<1x128xf32, #tpu.memory_space<any>>) target(%36 : memref<1x128xf32, #tpu.memory_space<vmem>>) target_semaphore(%38 : memref<!tpu.dma_semaphore, #tpu.memory_space<semaphore_mem>>)
    %c4_i32 = arith.constant 4 : i32
    %39 = arith.addi %2, %c4_i32 : i32
    %40 = arith.index_cast %39 : i32 to index
    %41 = memref.load %arg2[%40] : memref<16xi32, #tpu.memory_space<smem>>
    %c0_i32_24 = arith.constant 0 : i32
    %42 = arith.maxsi %41, %c0_i32_24 : i32
    %c63_i32_25 = arith.constant 63 : i32
    %43 = arith.minsi %42, %c63_i32_25 : i32
    %c4_i32_26 = arith.constant 4 : i32
    %c0_i32_27 = arith.constant 0 : i32
    %44 = tpu.memref_slice %arg3[%43, %c0_i32_27] : memref<64x128xf32, #tpu.memory_space<any>> -> memref<1x128xf32, #tpu.memory_space<any>>
    %c4_i32_28 = arith.constant 4 : i32
    %c0_i32_29 = arith.constant 0 : i32
    %45 = tpu.memref_slice %arg6[%c4_i32_28, %c0_i32_29] : memref<8x128xf32, #tpu.memory_space<vmem>> -> memref<1x128xf32, #tpu.memory_space<vmem>>
    %46 = tpu.memref_slice %arg7[%c4_i32_26] : memref<8x!tpu.dma_semaphore, #tpu.memory_space<semaphore_mem>> -> memref<1x!tpu.dma_semaphore, #tpu.memory_space<semaphore_mem>>
    %47 = tpu.memref_squeeze %46 : memref<1x!tpu.dma_semaphore, #tpu.memory_space<semaphore_mem>> -> memref<!tpu.dma_semaphore, #tpu.memory_space<semaphore_mem>>
    tpu.enqueue_dma source(%44 : memref<1x128xf32, #tpu.memory_space<any>>) target(%45 : memref<1x128xf32, #tpu.memory_space<vmem>>) target_semaphore(%47 : memref<!tpu.dma_semaphore, #tpu.memory_space<semaphore_mem>>)
    %c5_i32 = arith.constant 5 : i32
    %48 = arith.addi %2, %c5_i32 : i32
    %49 = arith.index_cast %48 : i32 to index
    %50 = memref.load %arg2[%49] : memref<16xi32, #tpu.memory_space<smem>>
    %c0_i32_30 = arith.constant 0 : i32
    %51 = arith.maxsi %50, %c0_i32_30 : i32
    %c63_i32_31 = arith.constant 63 : i32
    %52 = arith.minsi %51, %c63_i32_31 : i32
    %c5_i32_32 = arith.constant 5 : i32
    %c0_i32_33 = arith.constant 0 : i32
    %53 = tpu.memref_slice %arg3[%52, %c0_i32_33] : memref<64x128xf32, #tpu.memory_space<any>> -> memref<1x128xf32, #tpu.memory_space<any>>
    %c5_i32_34 = arith.constant 5 : i32
    %c0_i32_35 = arith.constant 0 : i32
    %54 = tpu.memref_slice %arg6[%c5_i32_34, %c0_i32_35] : memref<8x128xf32, #tpu.memory_space<vmem>> -> memref<1x128xf32, #tpu.memory_space<vmem>>
    %55 = tpu.memref_slice %arg7[%c5_i32_32] : memref<8x!tpu.dma_semaphore, #tpu.memory_space<semaphore_mem>> -> memref<1x!tpu.dma_semaphore, #tpu.memory_space<semaphore_mem>>
    %56 = tpu.memref_squeeze %55 : memref<1x!tpu.dma_semaphore, #tpu.memory_space<semaphore_mem>> -> memref<!tpu.dma_semaphore, #tpu.memory_space<semaphore_mem>>
    tpu.enqueue_dma source(%53 : memref<1x128xf32, #tpu.memory_space<any>>) target(%54 : memref<1x128xf32, #tpu.memory_space<vmem>>) target_semaphore(%56 : memref<!tpu.dma_semaphore, #tpu.memory_space<semaphore_mem>>)
    %c6_i32 = arith.constant 6 : i32
    %57 = arith.addi %2, %c6_i32 : i32
    %58 = arith.index_cast %57 : i32 to index
    %59 = memref.load %arg2[%58] : memref<16xi32, #tpu.memory_space<smem>>
    %c0_i32_36 = arith.constant 0 : i32
    %60 = arith.maxsi %59, %c0_i32_36 : i32
    %c63_i32_37 = arith.constant 63 : i32
    %61 = arith.minsi %60, %c63_i32_37 : i32
    %c6_i32_38 = arith.constant 6 : i32
    %c0_i32_39 = arith.constant 0 : i32
    %62 = tpu.memref_slice %arg3[%61, %c0_i32_39] : memref<64x128xf32, #tpu.memory_space<any>> -> memref<1x128xf32, #tpu.memory_space<any>>
    %c6_i32_40 = arith.constant 6 : i32
    %c0_i32_41 = arith.constant 0 : i32
    %63 = tpu.memref_slice %arg6[%c6_i32_40, %c0_i32_41] : memref<8x128xf32, #tpu.memory_space<vmem>> -> memref<1x128xf32, #tpu.memory_space<vmem>>
    %64 = tpu.memref_slice %arg7[%c6_i32_38] : memref<8x!tpu.dma_semaphore, #tpu.memory_space<semaphore_mem>> -> memref<1x!tpu.dma_semaphore, #tpu.memory_space<semaphore_mem>>
    %65 = tpu.memref_squeeze %64 : memref<1x!tpu.dma_semaphore, #tpu.memory_space<semaphore_mem>> -> memref<!tpu.dma_semaphore, #tpu.memory_space<semaphore_mem>>
    tpu.enqueue_dma source(%62 : memref<1x128xf32, #tpu.memory_space<any>>) target(%63 : memref<1x128xf32, #tpu.memory_space<vmem>>) target_semaphore(%65 : memref<!tpu.dma_semaphore, #tpu.memory_space<semaphore_mem>>)
    %c7_i32 = arith.constant 7 : i32
    %66 = arith.addi %2, %c7_i32 : i32
    %67 = arith.index_cast %66 : i32 to index
    %68 = memref.load %arg2[%67] : memref<16xi32, #tpu.memory_space<smem>>
    %c0_i32_42 = arith.constant 0 : i32
    %69 = arith.maxsi %68, %c0_i32_42 : i32
    %c63_i32_43 = arith.constant 63 : i32
    %70 = arith.minsi %69, %c63_i32_43 : i32
    %c7_i32_44 = arith.constant 7 : i32
    %c0_i32_45 = arith.constant 0 : i32
    %71 = tpu.memref_slice %arg3[%70, %c0_i32_45] : memref<64x128xf32, #tpu.memory_space<any>> -> memref<1x128xf32, #tpu.memory_space<any>>
    %c7_i32_46 = arith.constant 7 : i32
    %c0_i32_47 = arith.constant 0 : i32
    %72 = tpu.memref_slice %arg6[%c7_i32_46, %c0_i32_47] : memref<8x128xf32, #tpu.memory_space<vmem>> -> memref<1x128xf32, #tpu.memory_space<vmem>>
    %73 = tpu.memref_slice %arg7[%c7_i32_44] : memref<8x!tpu.dma_semaphore, #tpu.memory_space<semaphore_mem>> -> memref<1x!tpu.dma_semaphore, #tpu.memory_space<semaphore_mem>>
    %74 = tpu.memref_squeeze %73 : memref<1x!tpu.dma_semaphore, #tpu.memory_space<semaphore_mem>> -> memref<!tpu.dma_semaphore, #tpu.memory_space<semaphore_mem>>
    tpu.enqueue_dma source(%71 : memref<1x128xf32, #tpu.memory_space<any>>) target(%72 : memref<1x128xf32, #tpu.memory_space<vmem>>) target_semaphore(%74 : memref<!tpu.dma_semaphore, #tpu.memory_space<semaphore_mem>>)
    %c0_i32_48 = arith.constant 0 : i32
    %c0_i32_49 = arith.constant 0 : i32
    %75 = tpu.memref_slice %arg3[%7, %c0_i32_49] : memref<64x128xf32, #tpu.memory_space<any>> -> memref<1x128xf32, #tpu.memory_space<any>>
    %c0_i32_50 = arith.constant 0 : i32
    %c0_i32_51 = arith.constant 0 : i32
    %76 = tpu.memref_slice %arg6[%c0_i32_50, %c0_i32_51] : memref<8x128xf32, #tpu.memory_space<vmem>> -> memref<1x128xf32, #tpu.memory_space<vmem>>
    %77 = tpu.memref_slice %arg7[%c0_i32_48] : memref<8x!tpu.dma_semaphore, #tpu.memory_space<semaphore_mem>> -> memref<1x!tpu.dma_semaphore, #tpu.memory_space<semaphore_mem>>
    %78 = tpu.memref_squeeze %77 : memref<1x!tpu.dma_semaphore, #tpu.memory_space<semaphore_mem>> -> memref<!tpu.dma_semaphore, #tpu.memory_space<semaphore_mem>>
    tpu.wait_dma2 semaphore(%78 : memref<!tpu.dma_semaphore, #tpu.memory_space<semaphore_mem>>) src(%75 : memref<1x128xf32, #tpu.memory_space<any>>) dst(%76 : memref<1x128xf32, #tpu.memory_space<vmem>>)
    %c1_i32_52 = arith.constant 1 : i32
    %c0_i32_53 = arith.constant 0 : i32
    %79 = tpu.memref_slice %arg3[%16, %c0_i32_53] : memref<64x128xf32, #tpu.memory_space<any>> -> memref<1x128xf32, #tpu.memory_space<any>>
    %c1_i32_54 = arith.constant 1 : i32
    %c0_i32_55 = arith.constant 0 : i32
    %80 = tpu.memref_slice %arg6[%c1_i32_54, %c0_i32_55] : memref<8x128xf32, #tpu.memory_space<vmem>> -> memref<1x128xf32, #tpu.memory_space<vmem>>
    %81 = tpu.memref_slice %arg7[%c1_i32_52] : memref<8x!tpu.dma_semaphore, #tpu.memory_space<semaphore_mem>> -> memref<1x!tpu.dma_semaphore, #tpu.memory_space<semaphore_mem>>
    %82 = tpu.memref_squeeze %81 : memref<1x!tpu.dma_semaphore, #tpu.memory_space<semaphore_mem>> -> memref<!tpu.dma_semaphore, #tpu.memory_space<semaphore_mem>>
    tpu.wait_dma2 semaphore(%82 : memref<!tpu.dma_semaphore, #tpu.memory_space<semaphore_mem>>) src(%79 : memref<1x128xf32, #tpu.memory_space<any>>) dst(%80 : memref<1x128xf32, #tpu.memory_space<vmem>>)
    %c2_i32_56 = arith.constant 2 : i32
    %c0_i32_57 = arith.constant 0 : i32
    %83 = tpu.memref_slice %arg3[%25, %c0_i32_57] : memref<64x128xf32, #tpu.memory_space<any>> -> memref<1x128xf32, #tpu.memory_space<any>>
    %c2_i32_58 = arith.constant 2 : i32
    %c0_i32_59 = arith.constant 0 : i32
    %84 = tpu.memref_slice %arg6[%c2_i32_58, %c0_i32_59] : memref<8x128xf32, #tpu.memory_space<vmem>> -> memref<1x128xf32, #tpu.memory_space<vmem>>
    %85 = tpu.memref_slice %arg7[%c2_i32_56] : memref<8x!tpu.dma_semaphore, #tpu.memory_space<semaphore_mem>> -> memref<1x!tpu.dma_semaphore, #tpu.memory_space<semaphore_mem>>
    %86 = tpu.memref_squeeze %85 : memref<1x!tpu.dma_semaphore, #tpu.memory_space<semaphore_mem>> -> memref<!tpu.dma_semaphore, #tpu.memory_space<semaphore_mem>>
    tpu.wait_dma2 semaphore(%86 : memref<!tpu.dma_semaphore, #tpu.memory_space<semaphore_mem>>) src(%83 : memref<1x128xf32, #tpu.memory_space<any>>) dst(%84 : memref<1x128xf32, #tpu.memory_space<vmem>>)
    %c3_i32_60 = arith.constant 3 : i32
    %c0_i32_61 = arith.constant 0 : i32
    %87 = tpu.memref_slice %arg3[%34, %c0_i32_61] : memref<64x128xf32, #tpu.memory_space<any>> -> memref<1x128xf32, #tpu.memory_space<any>>
    %c3_i32_62 = arith.constant 3 : i32
    %c0_i32_63 = arith.constant 0 : i32
    %88 = tpu.memref_slice %arg6[%c3_i32_62, %c0_i32_63] : memref<8x128xf32, #tpu.memory_space<vmem>> -> memref<1x128xf32, #tpu.memory_space<vmem>>
    %89 = tpu.memref_slice %arg7[%c3_i32_60] : memref<8x!tpu.dma_semaphore, #tpu.memory_space<semaphore_mem>> -> memref<1x!tpu.dma_semaphore, #tpu.memory_space<semaphore_mem>>
    %90 = tpu.memref_squeeze %89 : memref<1x!tpu.dma_semaphore, #tpu.memory_space<semaphore_mem>> -> memref<!tpu.dma_semaphore, #tpu.memory_space<semaphore_mem>>
    tpu.wait_dma2 semaphore(%90 : memref<!tpu.dma_semaphore, #tpu.memory_space<semaphore_mem>>) src(%87 : memref<1x128xf32, #tpu.memory_space<any>>) dst(%88 : memref<1x128xf32, #tpu.memory_space<vmem>>)
    %c4_i32_64 = arith.constant 4 : i32
    %c0_i32_65 = arith.constant 0 : i32
    %91 = tpu.memref_slice %arg3[%43, %c0_i32_65] : memref<64x128xf32, #tpu.memory_space<any>> -> memref<1x128xf32, #tpu.memory_space<any>>
    %c4_i32_66 = arith.constant 4 : i32
    %c0_i32_67 = arith.constant 0 : i32
    %92 = tpu.memref_slice %arg6[%c4_i32_66, %c0_i32_67] : memref<8x128xf32, #tpu.memory_space<vmem>> -> memref<1x128xf32, #tpu.memory_space<vmem>>
    %93 = tpu.memref_slice %arg7[%c4_i32_64] : memref<8x!tpu.dma_semaphore, #tpu.memory_space<semaphore_mem>> -> memref<1x!tpu.dma_semaphore, #tpu.memory_space<semaphore_mem>>
    %94 = tpu.memref_squeeze %93 : memref<1x!tpu.dma_semaphore, #tpu.memory_space<semaphore_mem>> -> memref<!tpu.dma_semaphore, #tpu.memory_space<semaphore_mem>>
    tpu.wait_dma2 semaphore(%94 : memref<!tpu.dma_semaphore, #tpu.memory_space<semaphore_mem>>) src(%91 : memref<1x128xf32, #tpu.memory_space<any>>) dst(%92 : memref<1x128xf32, #tpu.memory_space<vmem>>)
    %c5_i32_68 = arith.constant 5 : i32
    %c0_i32_69 = arith.constant 0 : i32
    %95 = tpu.memref_slice %arg3[%52, %c0_i32_69] : memref<64x128xf32, #tpu.memory_space<any>> -> memref<1x128xf32, #tpu.memory_space<any>>
    %c5_i32_70 = arith.constant 5 : i32
    %c0_i32_71 = arith.constant 0 : i32
    %96 = tpu.memref_slice %arg6[%c5_i32_70, %c0_i32_71] : memref<8x128xf32, #tpu.memory_space<vmem>> -> memref<1x128xf32, #tpu.memory_space<vmem>>
    %97 = tpu.memref_slice %arg7[%c5_i32_68] : memref<8x!tpu.dma_semaphore, #tpu.memory_space<semaphore_mem>> -> memref<1x!tpu.dma_semaphore, #tpu.memory_space<semaphore_mem>>
    %98 = tpu.memref_squeeze %97 : memref<1x!tpu.dma_semaphore, #tpu.memory_space<semaphore_mem>> -> memref<!tpu.dma_semaphore, #tpu.memory_space<semaphore_mem>>
    tpu.wait_dma2 semaphore(%98 : memref<!tpu.dma_semaphore, #tpu.memory_space<semaphore_mem>>) src(%95 : memref<1x128xf32, #tpu.memory_space<any>>) dst(%96 : memref<1x128xf32, #tpu.memory_space<vmem>>)
    %c6_i32_72 = arith.constant 6 : i32
    %c0_i32_73 = arith.constant 0 : i32
    %99 = tpu.memref_slice %arg3[%61, %c0_i32_73] : memref<64x128xf32, #tpu.memory_space<any>> -> memref<1x128xf32, #tpu.memory_space<any>>
    %c6_i32_74 = arith.constant 6 : i32
    %c0_i32_75 = arith.constant 0 : i32
    %100 = tpu.memref_slice %arg6[%c6_i32_74, %c0_i32_75] : memref<8x128xf32, #tpu.memory_space<vmem>> -> memref<1x128xf32, #tpu.memory_space<vmem>>
    %101 = tpu.memref_slice %arg7[%c6_i32_72] : memref<8x!tpu.dma_semaphore, #tpu.memory_space<semaphore_mem>> -> memref<1x!tpu.dma_semaphore, #tpu.memory_space<semaphore_mem>>
    %102 = tpu.memref_squeeze %101 : memref<1x!tpu.dma_semaphore, #tpu.memory_space<semaphore_mem>> -> memref<!tpu.dma_semaphore, #tpu.memory_space<semaphore_mem>>
    tpu.wait_dma2 semaphore(%102 : memref<!tpu.dma_semaphore, #tpu.memory_space<semaphore_mem>>) src(%99 : memref<1x128xf32, #tpu.memory_space<any>>) dst(%100 : memref<1x128xf32, #tpu.memory_space<vmem>>)
    %c7_i32_76 = arith.constant 7 : i32
    %c0_i32_77 = arith.constant 0 : i32
    %103 = tpu.memref_slice %arg3[%70, %c0_i32_77] : memref<64x128xf32, #tpu.memory_space<any>> -> memref<1x128xf32, #tpu.memory_space<any>>
    %c7_i32_78 = arith.constant 7 : i32
    %c0_i32_79 = arith.constant 0 : i32
    %104 = tpu.memref_slice %arg6[%c7_i32_78, %c0_i32_79] : memref<8x128xf32, #tpu.memory_space<vmem>> -> memref<1x128xf32, #tpu.memory_space<vmem>>
    %105 = tpu.memref_slice %arg7[%c7_i32_76] : memref<8x!tpu.dma_semaphore, #tpu.memory_space<semaphore_mem>> -> memref<1x!tpu.dma_semaphore, #tpu.memory_space<semaphore_mem>>
    %106 = tpu.memref_squeeze %105 : memref<1x!tpu.dma_semaphore, #tpu.memory_space<semaphore_mem>> -> memref<!tpu.dma_semaphore, #tpu.memory_space<semaphore_mem>>
    tpu.wait_dma2 semaphore(%106 : memref<!tpu.dma_semaphore, #tpu.memory_space<semaphore_mem>>) src(%103 : memref<1x128xf32, #tpu.memory_space<any>>) dst(%104 : memref<1x128xf32, #tpu.memory_space<vmem>>)
    %c0 = arith.constant 0 : index
    %c0_80 = arith.constant 0 : index
    %107 = vector.load %arg6[%c0, %c0_80] : memref<8x128xf32, #tpu.memory_space<vmem>>, vector<8x128xf32>
    %c0_81 = arith.constant 0 : index
    %c0_82 = arith.constant 0 : index
    %108 = vector.load %arg4[%c0_81, %c0_82] : memref<8x128xf32, #tpu.memory_space<vmem>>, vector<8x128xf32>
    %109 = arith.addf %107, %108 : vector<8x128xf32>
    %c0_83 = arith.constant 0 : index
    %c0_84 = arith.constant 0 : index
    %c0_85 = arith.constant 0 : index
    %110 = vector.load %arg5[%c0_83, %c0_84, %c0_85] : memref<1x8x128xf32, #tpu.memory_space<vmem>>, vector<1x8x128xf32>
    %111 = vector.shape_cast %110 : vector<1x8x128xf32> to vector<8x128xf32>
    %112 = vector.shape_cast %109 : vector<8x128xf32> to vector<1x8x128xf32>
    tpu.vector_store %arg5[%c0_83, %c0_84, %c0_85], %112 {strides = array<i32>} : memref<1x8x128xf32, #tpu.memory_space<vmem>>, vector<1x8x128xf32>,
    return
  }
  func.func @transform_1(%arg0: i32, %arg1: i32, %arg2: memref<16xi32, #tpu.memory_space<smem>>) -> (i32, i32) {
    %c0_i32 = arith.constant 0 : i32
    %c0_i32_0 = arith.constant 0 : i32
    return %arg1, %c0_i32 : i32, i32
  }
  func.func @transform_2(%arg0: i32, %arg1: i32, %arg2: memref<16xi32, #tpu.memory_space<smem>>) -> (i32, i32, i32) {
    %c0_i32 = arith.constant 0 : i32
    %c0_i32_0 = arith.constant 0 : i32
    return %arg0, %arg1, %c0_i32 : i32, i32, i32
  }
}

</mosaic_0001>

<bundles_post_ra>
// kernel: tpu_custom_call.1
= control target key start
LH: loop header
LB: loop body
LE: loop exit
PB: predicated region body
PF: predicated region fallthrough
CT: control target
= control target key end

     0   :  { %s975_s15 = smov [#allocation5]   ;;  %s1237_s0 = inlined_call_operand.hbm [shape: s32[16], index: 0, kind: input, shape index: {}]   ;;  %s1238_s1 = inlined_call_operand.hbm [shape: f32[64,128], index: 1, kind: input, shape index: {}]   ;;  %s1239_s2 = inlined_call_operand.hbm [shape: f32[16,128], index: 2, kind: input, shape index: {}]   ;;  %s1240_s3 = inlined_call_operand.hbm [shape: f32[2,8,128], index: 3, kind: output, shape index: {}]  }
   0x1   :  { %s9_s14 = sshll.u32 %s1237_s0, 4  ;;  %s10_s14 = int_to_ptr.hbm [resolvable:$true] %s9_s14 }
   0x2   :  { %12 = dma.hbm_to_smem %s10_s14, 16, %s975_s15, [#allocation4] }
   0x3   :  { %925 = dma.done.wait [#allocation4], 16 }
   0x4   :  { %926 = vsyncadd [#allocation4], 4294967280 }
   0x5   :  { %15 = sfence }
   0x6   :  { %16 = vsyncpa [#allocation7], 0 }
   0x7   :  { %17 = vsyncpa [#allocation8], 0 }
   0x8   :  { %19 = vsyncpa [#allocation8 + $0x1], 0  ;;  %s1008_s16 = smov 0   ;;  %s1010_s17 = smov 0  }
   0x9   :  { %s1012_s18 = smov 0   ;;  %s1014_s19 = smov 0  }
   0xa   :  { %s1016_s20 = smov 0   ;;  %s1018_s0 = smov 0  }
   0xb LB: > { %s488_s21 = sadd.s32 4294967295, %s973_s0   ;;  %s489_s22 = sadd.s32 4294967294, %s973_s0   ;;  %s973_s0 = sphi %s1018_s0, %s25_s0   ;;  %s969_s20 = sphi %s1016_s20, %s1249_s20   ;;  %s965_s19 = sphi %s1014_s19, %s1248_s19   ;;  %s961_s18 = sphi %s1012_s18, %s1247_s18   ;;  %s957_s17 = sphi %s1010_s17, %s1246_s17   ;;  %s953_s16 = sphi %s1008_s16, %s1245_s16  }
   0xc   : > { %s37_s23 = sadd.s32 1, %s969_s20  ;;  %s72_s24 = sadd.s32 1, %s961_s18 }
   0xd   : > { %p39_p0 = scmp.ge.s32.totalorder %s37_s23, 2  ;;  %p82_p1 = scmp.ne.s32.totalorder %s961_s18, %s957_s17 }
   0xe   : > { %p83_p2 = scmp.eq.s32.totalorder %s488_s21, 1  ;;  %p88_p3 = scmp.ne.s32.totalorder %s957_s17, %s953_s16 }
   0xf   : > { %s1251_s23 = smov (%p39_p0, %s37_s23), 0  ;;  %p89_p5 = scmp.eq.s32.totalorder %s489_s22, 1 }
  0x10   : > { %p1048_p4 = por %p83_p2, %p82_p1  ;;  %s67_s26 = ssub.s32 %s969_s20, %s1251_s23 }
  0x11   : > { %p490_p6 = scmp.ge.s32.totalorder %s973_s0, 1  ;;  %p70_p7 = scmp.eq.s32.totalorder %s67_s26, 0 }
  0x12   : > { %p1055_p8 = por %p89_p5, %p88_p3  ;;  %p96_p9 = scmp.lt.s32.totalorder %s973_s0, 3 }
  0x13   : > { %s1061_s28 = scalar_select %p70_p7, %s961_s18, %s72_s24  }
  0x14   : > { %p97_p10 = pnand %p490_p6, %p96_p9  ;;  %p578_p11 = scmp.eq.s32.totalorder %s488_s21, 0 }
  0x15   : > { %s110_s4 = sshll.u32 %s1239_s2, 4  ;;  %s976_s5 = smov [#allocation6]   ;;  %s111_s4 = int_to_ptr.hbm [resolvable:$true] %s110_s4 }
  0x16   : > { %p570_p12 = pneg %p97_p10  ;;  %s112_s6 = sshll.u32 %s976_s5, 4  ;;  %s113_s6 = int_to_ptr.vmem [resolvable:$true] %s112_s6 }
  0x17   : > { %125 = sbr.rel (%p97_p10) target bundleno = 190 (0xbe), region = 24 }
  0x18   : > { %p571_p13 = pnand %p578_p11, %p570_p12 }
  0x1a   : > { %573 = dma.hbm_to_vmem [thread:$0]  (!%p571_p13), %s111_s4, 128, %s113_s6, [#allocation7]  }
  0x1c   : > { %928 = dma.done.wait (%p578_p11), [#allocation7], 128  }
  0x1d   : > { %930 = vsyncadd (%p578_p11), [#allocation7], 4294967168  ;;  %s1241_s7 = sand.u32 1, %s957_s17   ;;  %s1068_s8 = sshll.u32 %s965_s19, 3 }
  0x1e   : > { %s1072_s9 = sshll.u32 %s1241_s7, 3  ;;  %s144_s10 = sld [smem:[#allocation5 + %s1068_s8]] }
  0x1f   : > { %s163_s11 = sadd.s32 1, %s1068_s8  ;;  %s977_s12 = smov [#allocation2]  }
  0x20   : > { %s1076_s13 = sshll.u32 %s977_s12, 4  ;;  %s1078_s14 = sld [smem:[#allocation5 + %s163_s11]]  ;;  %s160_s13 = int_to_ptr.vmem [resolvable:$true] %s1076_s13 }
  0x21   : > { %s185_s15 = sadd.s32 2, %s1068_s8  ;;  %s978_s19 = smov [#allocation2 + $0x1]  }
  0x22   : > { %s1081_s21 = sshll.u32 %s978_s19, 4  ;;  %s1083_s22 = sld [smem:[#allocation5 + %s185_s15]]  ;;  %s182_s21 = int_to_ptr.vmem [resolvable:$true] %s1081_s21 }
  0x23   : > { %s1098_s15 = scalar_lea.hbm %s1238_s1, 64 }
  0x24   : > { %p145_p0 = scmp.gt.s32.totalorder %s144_s10, 0  ;;  %p496_p1 = scmp.lt.s32.totalorder %s144_s10, 63 }
  0x26   : > { %s1253_s10 = smov (!%p145_p0, %s144_s10), 0  ;;  %p165_p2 = scmp.gt.s32.totalorder %s1078_s14, 0 }
  0x27   : > { %s1255_s10 = smov (!%p496_p1, %s1253_s10), 63  ;;  %p501_p3 = scmp.lt.s32.totalorder %s1078_s14, 63 }
  0x28   : > { %s166_s24 = scalar_select %p165_p2, %s1078_s14, 0 }
  0x29   : > { %s149_s30 = scalar_lea.hbm %s1238_s1, %s1255_s10  ;;  %p187_p5 = scmp.gt.s32.totalorder %s1083_s22, 0 }
  0x2a   : > { %s157_s4 = sshll.u32 %s149_s30, 4  ;;  %p506_p6 = scmp.lt.s32.totalorder %s1083_s22, 63  ;;  %s158_s4 = int_to_ptr.hbm [resolvable:$true] %s157_s4 }
  0x2b   : > { %s681_s5 = sshra.s32 %s158_s4, 4  ;;  %s682_s5 = int_to_ptr.hbm [resolvable:$true] %s681_s5 }
  0x2c   : > { %s683_s6 = scalar_lea.hbm %s682_s5, 1  ;;  %p686_p9 = scmp.lt.s32.totalorder %s682_s5, %s1238_s1 }
  0x2d   : > { %p684_p7 = scmp.ne.s32.totalorder %s682_s5, %s683_s6  ;;  %p687_p10 = scmp.lt.s32.totalorder %s1098_s15, %s683_s6 }
  0x2f   : > { %p688_p11 = por %p687_p10, %p686_p9 }
  0x31   : > { %p689_p12 = pnand %p688_p11, %p684_p7 }
  0x33   : > { %692 = shalt.err (!%p689_p12)  }
  0x34   : > { %162 = dma.hbm_to_vmem [thread:$0]  %s158_s4, 16, %s160_s13, [#allocation3] }
  0x35   : > { %s1257_s24 = smov (!%p501_p3, %s166_s24), 63  ;;  %s979_s30 = smov [#allocation2 + $0x2]  }
  0x36   : > { %s188_s10 = scalar_select %p187_p5, %s1083_s22, 0 }
  0x37   : > { %s169_s7 = scalar_lea.hbm %s1238_s1, %s1257_s24  ;;  %s1112_s5 = sshll.u32 %s979_s30, 4  ;;  %s204_s5 = int_to_ptr.vmem [resolvable:$true] %s1112_s5 }
  0x38   : > { %s179_s6 = sshll.u32 %s169_s7, 4  ;;  %s207_s11 = sadd.s32 3, %s1068_s8  ;;  %s180_s6 = int_to_ptr.hbm [resolvable:$true] %s179_s6 }
  0x39   : > { %s1115_s13 = sld [smem:[#allocation5 + %s207_s11]]  ;;  %s705_s14 = sshra.s32 %s180_s6, 4  ;;  %s706_s14 = int_to_ptr.hbm [resolvable:$true] %s705_s14 }
  0x3a   : > { %s707_s4 = scalar_lea.hbm %s706_s14, 1  ;;  %p710_p0 = scmp.lt.s32.totalorder %s706_s14, %s1238_s1 }
  0x3b   : > { %p708_p13 = scmp.ne.s32.totalorder %s706_s14, %s707_s4  ;;  %p711_p1 = scmp.lt.s32.totalorder %s1098_s15, %s707_s4 }
  0x3d   : > { %p712_p2 = por %p711_p1, %p710_p0 }
  0x3f   : > { %p713_p3 = pnand %p712_p2, %p708_p13 }
  0x41   : > { %716 = shalt.err (!%p713_p3)  }
  0x42   : > { %184 = dma.hbm_to_vmem [thread:$0]  %s180_s6, 16, %s182_s21, [#allocation3 + $0x1] }
  0x43   : > { %s1259_s10 = smov (!%p506_p6, %s188_s10), 63  ;;  %s229_s7 = sadd.s32 4, %s1068_s8 }
  0x44   : > { %s191_s29 = scalar_lea.hbm %s1238_s1, %s1259_s10  ;;  %s980_s11 = smov [#allocation2 + $0x3]  }
  0x45   : > { %s201_s30 = sshll.u32 %s191_s29, 4  ;;  %s1130_s14 = sshll.u32 %s980_s11, 4  ;;  %s202_s30 = int_to_ptr.hbm [resolvable:$true] %s201_s30  ;;  %s226_s14 = int_to_ptr.vmem [resolvable:$true] %s1130_s14 }
  0x46   : > { %p209_p5 = scmp.gt.s32.totalorder %s1115_s13, 0  ;;  %s729_s4 = sshra.s32 %s202_s30, 4  ;;  %s730_s4 = int_to_ptr.hbm [resolvable:$true] %s729_s4 }
  0x47   : > { %s731_s12 = scalar_lea.hbm %s730_s4, 1  ;;  %p734_p6 = scmp.lt.s32.totalorder %s730_s4, %s1238_s1 }
  0x48   : > { %p732_p7 = scmp.ne.s32.totalorder %s730_s4, %s731_s12  ;;  %p735_p9 = scmp.lt.s32.totalorder %s1098_s15, %s731_s12 }
  0x4a   : > { %p736_p10 = por %p735_p9, %p734_p6 }
  0x4c   : > { %p737_p11 = pnand %p736_p10, %p732_p7 }
  0x4e   : > { %740 = shalt.err (!%p737_p11)  }
  0x4f   : > { %206 = dma.hbm_to_vmem [thread:$0]  %s202_s30, 16, %s204_s5, [#allocation3 + $0x2] }
  0x50   : > { %s210_s22 = scalar_select %p209_p5, %s1115_s13, 0 }
  0x51   : > { %p511_p12 = scmp.lt.s32.totalorder %s1115_s13, 63  ;;  %s230_s10 = sld [smem:[#allocation5 + %s229_s7]] }
  0x52   : > { %s251_s6 = sadd.s32 5, %s1068_s8  ;;  %s981_s24 = smov [#allocation2 + $0x4]  }
  0x53   : > { %s1261_s22 = smov (!%p511_p12, %s210_s22), 63  ;;  %s1140_s26 = sshll.u32 %s981_s24, 4  ;;  %s248_s26 = int_to_ptr.vmem [resolvable:$true] %s1140_s26 }
  0x54   : > { %s1142_s29 = sld [smem:[#allocation5 + %s251_s6]]  ;;  %s213_s5 = scalar_lea.hbm %s1238_s1, %s1261_s22 }
  0x55   : > { %s223_s30 = sshll.u32 %s213_s5, 4  ;;  %s224_s30 = int_to_ptr.hbm [resolvable:$true] %s223_s30 }
  0x56   : > { %s753_s13 = sshra.s32 %s224_s30, 4  ;;  %s754_s13 = int_to_ptr.hbm [resolvable:$true] %s753_s13 }
  0x57   : > { %p231_p13 = scmp.gt.s32.totalorder %s230_s10, 0  ;;  %s755_s7 = scalar_lea.hbm %s754_s13, 1 }
  0x58   : > { %p756_p0 = scmp.ne.s32.totalorder %s754_s13, %s755_s7  ;;  %p758_p1 = scmp.lt.s32.totalorder %s754_s13, %s1238_s1 }
  0x59   : > { %p759_p2 = scmp.lt.s32.totalorder %s1098_s15, %s755_s7 }
  0x5b   : > { %p760_p3 = por %p759_p2, %p758_p1 }
  0x5d   : > { %p761_p5 = pnand %p760_p3, %p756_p0 }
  0x5f   : > { %764 = shalt.err (!%p761_p5)  }
  0x60   : > { %228 = dma.hbm_to_vmem [thread:$0]  %s224_s30, 16, %s226_s14, [#allocation3 + $0x3] }
  0x61   : > { %s232_s21 = scalar_select %p231_p13, %s230_s10, 0 }
  0x62   : > { %p516_p7 = scmp.lt.s32.totalorder %s230_s10, 63  ;;  %p253_p6 = scmp.gt.s32.totalorder %s1142_s29, 0 }
  0x63   : > { %p521_p9 = scmp.lt.s32.totalorder %s1142_s29, 63  ;;  %s982_s4 = smov [#allocation2 + $0x5]  }
  0x64   : > { %s1263_s21 = smov (!%p516_p7, %s232_s21), 63  ;;  %s1159_s5 = sshll.u32 %s982_s4, 4  ;;  %s270_s5 = int_to_ptr.vmem [resolvable:$true] %s1159_s5 }
  0x65   : > { %s254_s22 = scalar_select %p253_p6, %s1142_s29, 0 }
  0x66   : > { %s235_s11 = scalar_lea.hbm %s1238_s1, %s1263_s21  ;;  %s273_s14 = sadd.s32 6, %s1068_s8 }
  0x67   : > { %s245_s13 = sshll.u32 %s235_s11, 4  ;;  %s1162_s30 = sld [smem:[#allocation5 + %s273_s14]]  ;;  %s246_s13 = int_to_ptr.hbm [resolvable:$true] %s245_s13 }
  0x68   : > { %s777_s7 = sshra.s32 %s246_s13, 4  ;;  %s778_s7 = int_to_ptr.hbm [resolvable:$true] %s777_s7 }
  0x69   : > { %s779_s10 = scalar_lea.hbm %s778_s7, 1  ;;  %p782_p11 = scmp.lt.s32.totalorder %s778_s7, %s1238_s1 }
  0x6a   : > { %p780_p10 = scmp.ne.s32.totalorder %s778_s7, %s779_s10  ;;  %p783_p12 = scmp.lt.s32.totalorder %s1098_s15, %s779_s10 }
  0x6c   : > { %p784_p13 = por %p783_p12, %p782_p11 }
  0x6e   : > { %p785_p0 = pnand %p784_p13, %p780_p10 }
  0x70   : > { %788 = shalt.err (!%p785_p0)  }
  0x71   : > { %250 = dma.hbm_to_vmem [thread:$0]  %s246_s13, 16, %s248_s26, [#allocation3 + $0x4] }
  0x72   : > { %s1265_s22 = smov (!%p521_p9, %s254_s22), 63  ;;  %s295_s4 = sadd.s32 7, %s1068_s8 }
  0x73   : > { %s257_s24 = scalar_lea.hbm %s1238_s1, %s1265_s22  ;;  %p275_p1 = scmp.gt.s32.totalorder %s1162_s30, 0 }
  0x74   : > { %s267_s11 = sshll.u32 %s257_s24, 4  ;;  %s268_s11 = int_to_ptr.hbm [resolvable:$true] %s267_s11 }
  0x75   : > { %s801_s14 = sshra.s32 %s268_s11, 4  ;;  %s802_s14 = int_to_ptr.hbm [resolvable:$true] %s801_s14 }
  0x76   : > { %s803_s7 = scalar_lea.hbm %s802_s14, 1  ;;  %p806_p3 = scmp.lt.s32.totalorder %s802_s14, %s1238_s1 }
  0x77   : > { %p804_p2 = scmp.ne.s32.totalorder %s802_s14, %s803_s7  ;;  %p807_p5 = scmp.lt.s32.totalorder %s1098_s15, %s803_s7 }
  0x79   : > { %p808_p7 = por %p807_p5, %p806_p3 }
  0x7b   : > { %p809_p6 = pnand %p808_p7, %p804_p2 }
  0x7d   : > { %812 = shalt.err (!%p809_p6)  }
  0x7e   : > { %272 = dma.hbm_to_vmem [thread:$0]  %s268_s11, 16, %s270_s5, [#allocation3 + $0x5] }
  0x7f   : > { %s276_s26 = scalar_select %p275_p1, %s1162_s30, 0 }
  0x80   : > { %p526_p9 = scmp.lt.s32.totalorder %s1162_s30, 63  ;;  %s296_s29 = sld [smem:[#allocation5 + %s295_s4]] }
  0x81   : > { %s983_s22 = smov [#allocation2 + $0x6]  }
  0x82   : > { %s291_s13 = sshll.u32 %s983_s22, 4  ;;  %s1267_s26 = smov (!%p526_p9, %s276_s26), 63  ;;  %s292_s13 = int_to_ptr.vmem [resolvable:$true] %s291_s13 }
  0x83   : > { %s279_s6 = scalar_lea.hbm %s1238_s1, %s1267_s26 }
  0x84   : > { %s289_s24 = sshll.u32 %s279_s6, 4  ;;  %s290_s24 = int_to_ptr.hbm [resolvable:$true] %s289_s24 }
  0x85   : > { %s825_s14 = sshra.s32 %s290_s24, 4  ;;  %s826_s14 = int_to_ptr.hbm [resolvable:$true] %s825_s14 }
  0x86   : > { %p297_p10 = scmp.gt.s32.totalorder %s296_s29, 0  ;;  %s827_s5 = scalar_lea.hbm %s826_s14, 1 }
  0x87   : > { %p828_p11 = scmp.ne.s32.totalorder %s826_s14, %s827_s5  ;;  %p830_p12 = scmp.lt.s32.totalorder %s826_s14, %s1238_s1 }
  0x88   : > { %p831_p13 = scmp.lt.s32.totalorder %s1098_s15, %s827_s5 }
  0x8a   : > { %p832_p0 = por %p831_p13, %p830_p12 }
  0x8c   : > { %p833_p1 = pnand %p832_p0, %p828_p11 }
  0x8e   : > { %836 = shalt.err (!%p833_p1)  }
  0x8f   : > { %294 = dma.hbm_to_vmem [thread:$0]  %s290_s24, 16, %s292_s13, [#allocation3 + $0x6] }
  0x90   : > { %s298_s30 = scalar_select %p297_p10, %s296_s29, 0 }
  0x91   : > { %p531_p2 = scmp.lt.s32.totalorder %s296_s29, 63  ;;  %s984_s4 = smov [#allocation2 + $0x7]  }
  0x92   : > { %s313_s10 = sshll.u32 %s984_s4, 4  ;;  %s314_s10 = int_to_ptr.vmem [resolvable:$true] %s313_s10 }
  0x93   : > { %s1269_s30 = smov (!%p531_p2, %s298_s30), 63 }
  0x94   : > { %s301_s22 = scalar_lea.hbm %s1238_s1, %s1269_s30 }
  0x95   : > { %s311_s19 = sshll.u32 %s301_s22, 4  ;;  %s312_s19 = int_to_ptr.hbm [resolvable:$true] %s311_s19 }
  0x96   : > { %s849_s21 = sshra.s32 %s312_s19, 4  ;;  %s850_s21 = int_to_ptr.hbm [resolvable:$true] %s849_s21 }
  0x97   : > { %s851_s6 = scalar_lea.hbm %s850_s21, 1  ;;  %p854_p5 = scmp.lt.s32.totalorder %s850_s21, %s1238_s1 }
  0x98   : > { %p852_p3 = scmp.ne.s32.totalorder %s850_s21, %s851_s6  ;;  %p855_p7 = scmp.lt.s32.totalorder %s1098_s15, %s851_s6 }
  0x9a   : > { %p856_p6 = por %p855_p7, %p854_p5 }
  0x9c   : > { %p857_p9 = pnand %p856_p6, %p852_p3 }
  0x9e   : > { %860 = shalt.err (!%p857_p9)  }
  0x9f   : > { %316 = dma.hbm_to_vmem [thread:$0]  %s312_s19, 16, %s314_s10, [#allocation3 + $0x7] }
  0xa0   : > { %s140_s29 = scalar_lea.vmem [#allocation9], %s1072_s9 }
  0xa1   : > { %931 = dma.done.wait [#allocation3], 16 }
  0xa2   : > { %932 = vsyncadd [#allocation3], 4294967280 }
  0xa3   : > { %933 = dma.done.wait [#allocation3 + $0x1], 16 }
  0xa4   : > { %934 = vsyncadd [#allocation3 + $0x1], 4294967280 }
  0xa5   : > { %935 = dma.done.wait [#allocation3 + $0x2], 16 }
  0xa6   : > { %936 = vsyncadd [#allocation3 + $0x2], 4294967280 }
  0xa7   : > { %937 = dma.done.wait [#allocation3 + $0x3], 16 }
  0xa8   : > { %938 = vsyncadd [#allocation3 + $0x3], 4294967280 }
  0xa9   : > { %939 = dma.done.wait [#allocation3 + $0x4], 16 }
  0xaa   : > { %940 = vsyncadd [#allocation3 + $0x4], 4294967280 }
  0xab   : > { %941 = dma.done.wait [#allocation3 + $0x5], 16 }
  0xac   : > { %942 = vsyncadd [#allocation3 + $0x5], 4294967280 }
  0xad   : > { %943 = dma.done.wait [#allocation3 + $0x6], 16 }
  0xae   : > { %944 = vsyncadd [#allocation3 + $0x6], 4294967280 }
  0xaf   : > { %945 = dma.done.wait [#allocation3 + $0x7], 16 }
  0xb0   : > { %946 = vsyncadd [#allocation3 + $0x7], 4294967280  ;;  %s350_s9 = scalar_lea.hbm %s1240_s3, %s1068_s8  ;;  %s352_s24 = sshll.u32 %s140_s29, 4  ;;  %v334_v0 = vld [vmem:[#allocation2] sm:$0xff]  ;;  %v335_v1 = vld [vmem:[#allocation6] sm:$0xff]  ;;  %s353_s24 = int_to_ptr.vmem [resolvable:$true] %s352_s24 }
  0xb1   : > { %s354_s11 = sshll.u32 %s350_s9, 4  ;;  %v336_v2 = vadd.f32 %v335_v1, %v334_v0  ;;  %s1244_s7 = sand.u32 1, %s957_s17   ;;  %s355_s11 = int_to_ptr.hbm [resolvable:$true] %s354_s11 }
  0xb2   : > { %s339_s30 = scalar_lea.sflag [#allocation8], %s1244_s7  ;;  %s887_s4 = sshra.s32 %s355_s11, 4  ;;  %s888_s4 = int_to_ptr.hbm [resolvable:$true] %s887_s4 }
  0xb3   : > { %337 = vst [vmem:[%s140_s29] sm:$0xff] %v336_v2  ;;  %s889_s10 = scalar_lea.hbm %s888_s4, 8  ;;  %s893_s8 = scalar_lea.hbm %s1240_s3, 16 }
  0xb4   : > { %p890_p10 = scmp.ne.s32.totalorder %s888_s4, %s889_s10  ;;  %p894_p13 = scmp.lt.s32.totalorder %s888_s4, %s1240_s3 }
  0xb5   : > { %p895_p0 = scmp.lt.s32.totalorder %s893_s8, %s889_s10 }
  0xb6   : > { %p891_p11 = pnand %p890_p10, %p1048_p4 }
  0xb7   : > { %p896_p1 = por %p895_p0, %p894_p13 }
  0xb8   : > { %p892_p12 = pneg %p891_p11 }
  0xba   : > { %p897_p2 = pnand %p896_p1, %p892_p12 }
  0xbc   : > { %900 = shalt.err (!%p897_p2)
}
  0xbd   : > { %568 = dma.vmem_to_hbm [thread:$0]  (%p1048_p4), %s353_s24, 128, %s355_s11, %s339_s30  }
  0xbe PF: > { %p580_p3 = scmp.ge.s32.totalorder %s973_s0, 2  ;;  %s366_s21 = sand.u32 1, %s953_s16  }
  0xbf   : > { %s367_s6 = scalar_lea.sflag [#allocation8], %s366_s21 }
  0xc0   : > { %p575_p5 = pnand %p580_p3, %p1055_p8 }
  0xc2   : > { %p576_p7 = pneg %p575_p5 }
  0xc4   : > { %948 = dma.done.wait (%p576_p7), %s367_s6, 128  }
  0xc5   : > { %950 = vsyncadd (%p576_p7), %s367_s6, 4294967168  ;;  %s25_s0 = sadd.s32 1, %s973_s0   ;;  %s1245_s16 = smov %s957_s17 }
  0xc6   : > { %p22_p6 = scmp.ge.s32.totalorder %s25_s0, 4   ;;  %s1246_s17 = smov %s961_s18 }
  0xc7   : > { %s1247_s18 = smov %s1061_s28  ;;  %s1248_s19 = smov %s969_s20 }
  0xc8   : > { %s1249_s20 = smov %s1251_s23  ;;  %24 = sbr.rel (!%p22_p6) target bundleno = 11 (0xb), region = 123 }
  0xcd   :  { %373 = vsyncpa [#allocation7], 1 }
  0xce   :  { %375 = vsyncpa [#allocation7 + $0x1], 1 }
  0xcf   :  { %376 = vsyncpa [#allocation8], 1 }
  0xd0   :  { %378 = vsyncpa [#allocation8 + $0x1], 1 }
  0xd1   :  { %379 = vsyncmov [#allocation3] }
  0xd4   :  { %s380_s25 = vpop.sfrf %379 }
  0xd5   :  { %p540_p4 = scmp.ne.s32.totalorder %s380_s25, 0 }
  0xd7   :  { %384 = shalt.err (%p540_p4)  }
  0xd8   :  { %386 = vsyncmov [#allocation3 + $0x1] }
  0xdb   :  { %s387_s27 = vpop.sfrf %386 }
  0xdc   :  { %p541_p8 = scmp.ne.s32.totalorder %s387_s27, 0 }
  0xde   :  { %391 = shalt.err (%p541_p8)  }
  0xdf   :  { %393 = vsyncmov [#allocation3 + $0x2] }
  0xe2   :  { %s394_s28 = vpop.sfrf %393 }
  0xe3   :  { %p542_p9 = scmp.ne.s32.totalorder %s394_s28, 0 }
  0xe5   :  { %398 = shalt.err (%p542_p9)  }
  0xe6   :  { %400 = vsyncmov [#allocation3 + $0x3] }
  0xe9   :  { %s401_s23 = vpop.sfrf %400 }
  0xea   :  { %p543_p10 = scmp.ne.s32.totalorder %s401_s23, 0 }
  0xec   :  { %405 = shalt.err (%p543_p10)  }
  0xed   :  { %407 = vsyncmov [#allocation3 + $0x4] }
  0xf0   :  { %s408_s1 = vpop.sfrf %407 }
  0xf1   :  { %p544_p11 = scmp.ne.s32.totalorder %s408_s1, 0 }
  0xf3   :  { %412 = shalt.err (%p544_p11)  }
  0xf4   :  { %414 = vsyncmov [#allocation3 + $0x5] }
  0xf7   :  { %s415_s2 = vpop.sfrf %414 }
  0xf8   :  { %p545_p12 = scmp.ne.s32.totalorder %s415_s2, 0 }
  0xfa   :  { %419 = shalt.err (%p545_p12)  }
  0xfb   :  { %421 = vsyncmov [#allocation3 + $0x6] }
  0xfe   :  { %s422_s3 = vpop.sfrf %421 }
  0xff   :  { %p546_p13 = scmp.ne.s32.totalorder %s422_s3, 0 }
 0x101   :  { %426 = shalt.err (%p546_p13)  }
 0x102   :  { %428 = vsyncmov [#allocation3 + $0x7] }
 0x105   :  { %s429_s16 = vpop.sfrf %428 }
 0x106   :  { %p547_p0 = scmp.ne.s32.totalorder %s429_s16, 0 }
 0x108   :  { %433 = shalt.err (%p547_p0)  }

</bundles_post_ra>
